<compile_context>
chip_gen: v7x
topology: tpu7x:2x2x1
jax: 0.10.0
libtpu: 0.0.40
codegen_flags: <defaults>
</compile_context>

<pallas_src>
import math
from functools import partial

import jax
import jax.numpy as jnp
from jax.experimental import pallas as pl
from jax.experimental.pallas import tpu as pltpu

BN_EPS = 1e-5


def _round_up(x, m):
    return ((x + m - 1) // m) * m


def _vmem_limit_bytes():
    # ~3/4 of physical VMEM (capped at 100 MiB): ~48-50 MiB on v7x (64 MiB),
    # ~96-100 MiB on v5e/v6e (128 MiB).  Falls back to a safe 48 MiB.
    try:
        cap = int(pltpu.get_tpu_info().vmem_capacity_bytes)
        return min((cap * 3) // 4, 100 * 1024 * 1024)
    except Exception:
        return 48 * 1024 * 1024


VMEM_LIMIT = _vmem_limit_bytes()


def _pick_row_tile(m, cap=4096):
    """Largest divisor of m that is <= cap and a multiple of 8 (else m)."""
    if m <= cap:
        return m
    for d in range(cap - (cap % 8), 0, -8):
        if m % d == 0:
            return d
    return m


# ----------------------- Pallas tiled matmul (bf16 MXU) -----------------------
def _matmul_kernel(a_ref, b_ref, o_ref, acc_ref):
    @pl.when(pl.program_id(2) == 0)
    def _():
        acc_ref[...] = jnp.zeros_like(acc_ref)

    acc_ref[...] += jnp.dot(a_ref[...], b_ref[...],
                            preferred_element_type=jnp.float32)

    @pl.when(pl.program_id(2) == pl.num_programs(2) - 1)
    def _():
        o_ref[...] = acc_ref[...].astype(o_ref.dtype)


def _matmul_bias_kernel(a_ref, b_ref, bias_ref, o_ref, acc_ref):
    @pl.when(pl.program_id(2) == 0)
    def _():
        acc_ref[...] = jnp.zeros_like(acc_ref)

    acc_ref[...] += jnp.dot(a_ref[...], b_ref[...],
                            preferred_element_type=jnp.float32)

    @pl.when(pl.program_id(2) == pl.num_programs(2) - 1)
    def _():
        o_ref[...] = (acc_ref[...] + bias_ref[...]).astype(o_ref.dtype)


def pallas_matmul(a, b, bias=None, out_dtype=jnp.bfloat16,
                  tm_cap=256, tn_cap=512, tk_cap=512):
    """a: (M, K), b: (K, N) -> (M, N).  bf16 operands, f32 accumulation.

    A dimension that fits in one tile uses a full-dim (unpadded) block, so
    e.g. the stem's K=147 never multiplies zero padding; otherwise tiles are
    bf16-friendly (tm % 16 == 0, tn/tk % 128 == 0)."""
    M, K = a.shape
    K2, N = b.shape
    assert K == K2
    if M <= tm_cap:
        tm, Mp = M, M
    else:
        tm, Mp = tm_cap, _round_up(M, tm_cap)          # tm_cap multiple of 16
    if N <= tn_cap:
        tn, Np = N, N
    else:
        tn, Np = tn_cap, _round_up(N, tn_cap)
    if K <= tk_cap:
        tk, Kp = K, K
    else:
        tk, Kp = tk_cap, _round_up(K, tk_cap)

    a_p = a.astype(jnp.bfloat16)
    b_p = b.astype(jnp.bfloat16)
    if (Mp, Kp) != (M, K):
        a_p = jnp.pad(a_p, ((0, Mp - M), (0, Kp - K)))
    if (Kp, Np) != (K, N):
        b_p = jnp.pad(b_p, ((0, Kp - K), (0, Np - N)))

    in_specs = [pl.BlockSpec((tm, tk), lambda i, j, k: (i, k)),
                pl.BlockSpec((tk, tn), lambda i, j, k: (k, j))]
    args = [a_p, b_p]
    kern = _matmul_kernel
    if bias is not None:
        bias_p = bias.reshape(1, N).astype(jnp.float32)
        if Np != N:
            bias_p = jnp.pad(bias_p, ((0, 0), (0, Np - N)))
        in_specs.append(pl.BlockSpec((1, tn), lambda i, j, k: (0, j)))
        args.append(bias_p)
        kern = _matmul_bias_kernel

    out_bytes = 2 if out_dtype == jnp.bfloat16 else 4
    cost = pl.CostEstimate(
        flops=int(2 * Mp * Np * Kp),
        transcendentals=0,
        bytes_accessed=int((Mp * Kp + Kp * Np) * 2 + Mp * Np * out_bytes))

    out = pl.pallas_call(
        kern,
        out_shape=jax.ShapeDtypeStruct((Mp, Np), out_dtype),
        grid=(Mp // tm, Np // tn, Kp // tk),
        in_specs=in_specs,
        out_specs=pl.BlockSpec((tm, tn), lambda i, j, k: (i, j)),
        scratch_shapes=[pltpu.VMEM((tm, tn), jnp.float32)],
        compiler_params=pltpu.CompilerParams(
            dimension_semantics=("parallel", "parallel", "arbitrary"),
            vmem_limit_bytes=VMEM_LIMIT),
        cost_estimate=cost,
    )(*args)
    if (Mp, Np) != (M, N):
        out = out[:M, :N]
    return out


# -------- Fused BatchNorm (batch stats) + ReLU (+ residual), two-pass ---------
def _bn_stats_kernel(x_ref, o_ref, acc_ref):
    # x_ref: (tmb, ct); o_ref: (2, ct) [sum; sumsq]; acc_ref: (2, ct) f32 scratch.
    @pl.when(pl.program_id(1) == 0)
    def _():
        acc_ref[...] = jnp.zeros_like(acc_ref)

    x = x_ref[...].astype(jnp.float32)
    acc_ref[...] += jnp.concatenate(
        [jnp.sum(x, axis=0, keepdims=True),
         jnp.sum(x * x, axis=0, keepdims=True)], axis=0)

    @pl.when(pl.program_id(1) == pl.num_programs(1) - 1)
    def _():
        o_ref[...] = acc_ref[...]


def _bn_apply_kernel(x_ref, scale_ref, shift_ref, o_ref, *, relu):
    y = x_ref[...].astype(jnp.float32) * scale_ref[...] + shift_ref[...]
    if relu:
        y = jnp.maximum(y, 0.0)
    o_ref[...] = y.astype(o_ref.dtype)


def _bn_apply_add_relu_kernel(x_ref, scale_ref, shift_ref, r_ref, o_ref):
    y = x_ref[...].astype(jnp.float32) * scale_ref[...] + shift_ref[...]
    y = y + r_ref[...].astype(jnp.float32)
    o_ref[...] = jnp.maximum(y, 0.0).astype(o_ref.dtype)


def batchnorm(x4d, gamma, beta, *, relu=False, residual=None,
              out_dtype=jnp.bfloat16):
    """x4d: (N,H,W,C).  BatchNorm2d, training mode (biased batch statistics).

    Pass 1 accumulates per-channel sum / sum-of-squares over row tiles
    (single traversal, f32); pass 2 applies the affine (+residual)(+ReLU).
    When C < 128 the (M, C) view is lane-packed to (M/rep, rep*C) so every
    load/store is 128-lane dense.
    """
    N, H, W, C = x4d.shape
    M = N * H * W
    rep = 1
    if C < 128 and 128 % C == 0 and M % (128 // C) == 0:
        rep = 128 // C
    Cw, Mw = C * rep, M // rep
    ct = 128 if Cw % 128 == 0 else Cw
    tmb = _pick_row_tile(Mw)
    x2 = x4d.reshape(Mw, Cw)

    # ---- pass 1: per-channel sum / sum-of-squares ----
    stats = pl.pallas_call(
        _bn_stats_kernel,
        out_shape=jax.ShapeDtypeStruct((2, Cw), jnp.float32),
        grid=(Cw // ct, Mw // tmb),
        in_specs=[pl.BlockSpec((tmb, ct), lambda c, m: (m, c))],
        out_specs=pl.BlockSpec((2, ct), lambda c, m: (0, c)),
        scratch_shapes=[pltpu.VMEM((2, ct), jnp.float32)],
        compiler_params=pltpu.CompilerParams(
            dimension_semantics=("parallel", "arbitrary"),
            vmem_limit_bytes=VMEM_LIMIT),
    )(x2)
    if rep > 1:
        stats = stats.reshape(2, rep, C).sum(axis=1)
    mean = stats[0] / M
    var = jnp.maximum(stats[1] / M - mean * mean, 0.0)   # guard cancellation
    scale = gamma.astype(jnp.float32) * jax.lax.rsqrt(var + BN_EPS)
    shift = beta.astype(jnp.float32) - mean * scale
    if rep > 1:
        scale = jnp.tile(scale, rep)
        shift = jnp.tile(shift, rep)
    scale2 = scale.reshape(1, Cw)
    shift2 = shift.reshape(1, Cw)

    # ---- pass 2: normalize (+ residual) (+ relu) ----
    in_specs = [pl.BlockSpec((tmb, ct), lambda m, c: (m, c)),
                pl.BlockSpec((1, ct), lambda m, c: (0, c)),
                pl.BlockSpec((1, ct), lambda m, c: (0, c))]
    args = [x2, scale2, shift2]
    if residual is not None:
        in_specs.append(pl.BlockSpec((tmb, ct), lambda m, c: (m, c)))
        args.append(residual.reshape(Mw, Cw))
        kern = _bn_apply_add_relu_kernel
    else:
        kern = partial(_bn_apply_kernel, relu=relu)

    out = pl.pallas_call(
        kern,
        out_shape=jax.ShapeDtypeStruct((Mw, Cw), out_dtype),
        grid=(Mw // tmb, Cw // ct),
        in_specs=in_specs,
        out_specs=pl.BlockSpec((tmb, ct), lambda m, c: (m, c)),
        compiler_params=pltpu.CompilerParams(
            dimension_semantics=("parallel", "parallel"),
            vmem_limit_bytes=VMEM_LIMIT),
    )(*args)
    return out.reshape(N, H, W, C)


# ----------------- Direct 3x3 convolution (group-packed) kernel ---------------
def _conv3x3_kernel(x_ref, w_ref, o_ref, *, stride, kh, kw, th, Wo):
    # x_ref: (1, P, Hq, Wq, Cin) stride-phase-split padded input for one image
    #        (resident across the row/out-channel tile axes).
    # w_ref: (kh*kw, Cin, dct)   per-tap (block-diagonal) weight matrices.
    # o_ref: (1, th, Wo, dct)    one row tile of the output.
    s = stride
    Wq = x_ref.shape[3]
    Cin = x_ref.shape[4]
    dct = o_ref.shape[3]
    row0 = pl.program_id(2) * th
    acc = jnp.zeros((th, Wo, dct), jnp.float32)
    for di in range(kh):
        ai, bi = di // s, di % s
        for dj in range(kw):
            aj, bj = dj // s, dj % s
            ph = bi * s + bj
            xs = x_ref[0, ph, pl.ds(row0 + ai, th), :, :]           # (th, Wq, Cin)
            part = jnp.dot(xs.reshape(th * Wq, Cin), w_ref[di * kw + dj],
                           preferred_element_type=jnp.float32)
            acc = acc + part.reshape(th, Wq, dct)[:, aj:aj + Wo, :]
    o_ref[0] = acc.astype(o_ref.dtype)


def _blockdiag_taps(w, groups):
    """PyTorch grouped-conv weight (Cout, Cin//G, kh, kw) -> per-tap
    block-diagonal dense matrices (kh*kw, Cin, Cout)."""
    Cout, Cg, kh, kw = w.shape
    G = groups
    Dg = Cout // G
    Cin = Cg * G
    wt = w.reshape(G, Dg, Cg, kh, kw).transpose(3, 4, 0, 2, 1)     # (kh,kw,G,Cg,Dg)
    eye = jnp.eye(G, dtype=wt.dtype)
    wbd = jnp.einsum("hwgcd,gk->hwgckd", wt, eye)                  # block-diagonal
    return wbd.reshape(kh * kw, Cin, Cout)


def conv3x3(x, w_taps, *, stride=1):
    """x: (N,H,W,Cin) NHWC;  w_taps: (9, Cin, Cout) per-tap weight matrices.

    Direct convolution: grid over (image, out-channel tile, output-row tile);
    the 9 taps are one dense MXU matmul each on a stride-phase-decomposed
    input, so all groups share the full lane width and no 9x im2col tensor or
    per-group layout glue ever touches HBM."""
    N, H, W, Cin = x.shape
    KK, Cin2, Cout = w_taps.shape
    assert Cin2 == Cin and KK == 9
    kh = kw = 3
    s, p = stride, 1
    Ho = (H + 2 * p - kh) // s + 1
    Wo = (W + 2 * p - kw) // s + 1

    xp = jnp.pad(x.astype(jnp.bfloat16), ((0, 0), (p, p), (p, p), (0, 0)))
    Hp, Wp = H + 2 * p, W + 2 * p
    if s == 1:
        phases = xp[:, None]                               # (N, 1, Hp, Wp, Cin)
        P, Hq, Wq0 = 1, Hp, Wp
    else:
        Hp2, Wp2 = _round_up(Hp, s), _round_up(Wp, s)
        xp = jnp.pad(xp, ((0, 0), (0, Hp2 - Hp), (0, Wp2 - Wp), (0, 0)))
        phases = jnp.stack([xp[:, bi::s, bj::s, :]
                            for bi in range(s) for bj in range(s)], axis=1)
        P, Hq, Wq0 = s * s, Hp2 // s, Wp2 // s
    Wq = _round_up(Wq0, 16)                                # clean sublane tiling
    if Wq != Wq0:
        phases = jnp.pad(phases,
                         ((0, 0), (0, 0), (0, 0), (0, Wq - Wq0), (0, 0)))

    # Row tiles give >= 2 pipelined grid steps per image where possible; the
    # out-channel tile bounds the resident weight block for very wide layers.
    th = max(d for d in range(1, min(Ho, 8) + 1) if Ho % d == 0)
    n_t = Ho // th
    dct = 512 if (Cout > 512 and Cout % 512 == 0) else Cout
    n_c = Cout // dct

    kern = partial(_conv3x3_kernel, stride=s, kh=kh, kw=kw, th=th, Wo=Wo)
    return pl.pallas_call(
        kern,
        out_shape=jax.ShapeDtypeStruct((N, Ho, Wo, Cout), jnp.bfloat16),
        grid=(N, n_c, n_t),
        in_specs=[pl.BlockSpec((1, P, Hq, Wq, Cin),
                               lambda n, c, t: (n, 0, 0, 0, 0)),
                  pl.BlockSpec((KK, Cin, dct), lambda n, c, t: (0, 0, c))],
        out_specs=pl.BlockSpec((1, th, Wo, dct), lambda n, c, t: (n, t, 0, c)),
        compiler_params=pltpu.CompilerParams(
            dimension_semantics=("parallel", "parallel", "parallel"),
            vmem_limit_bytes=VMEM_LIMIT),
    )(phases, w_taps.astype(jnp.bfloat16))


# ------------------------------ other convolutions ----------------------------
def conv1x1(x, w, stride=1):
    """x: (N,H,W,Cin);  w: (Cout, Cin, 1, 1)."""
    N, H, W, Cin = x.shape
    Cout = w.shape[0]
    if stride > 1:
        # TODO(synk): fold the strided subsample into the matmul's index_map
        # (or the preceding BN's store) to avoid this extra HBM slice pass.
        x = x[:, ::stride, ::stride, :]
        H, W = x.shape[1], x.shape[2]
    wm = w.reshape(Cout, Cin).T
    out = pallas_matmul(x.reshape(N * H * W, Cin), wm)
    return out.reshape(N, H, W, Cout)


def conv_stem(x, w, stride, padding):
    """7x7 stem conv via im2col + Pallas matmul (K=147 stays unpadded).
    Kept only for this single 3-input-channel layer; all 3x3 convs use the
    direct (im2col-free) kernel above."""
    N, H, W, Cin = x.shape
    Cout, _, kh, kw = w.shape
    Ho = (H + 2 * padding - kh) // stride + 1
    Wo = (W + 2 * padding - kw) // stride + 1
    xp = jnp.pad(x, ((0, 0), (padding, padding), (padding, padding), (0, 0)))
    cols = [xp[:, i:i + stride * Ho:stride, j:j + stride * Wo:stride, :]
            for i in range(kh) for j in range(kw)]
    patches = jnp.concatenate(cols, axis=-1).reshape(N * Ho * Wo, kh * kw * Cin)
    wm = jnp.transpose(w, (2, 3, 1, 0)).reshape(kh * kw * Cin, Cout)
    out = pallas_matmul(patches, wm)
    return out.reshape(N, Ho, Wo, Cout)


# ------------------------------ ResNeXt blocks --------------------------------
def bottleneck(x, p, cardinality):
    out = conv1x1(x, p["conv1_w"])                                        # 1x1
    out = batchnorm(out, p["bn1_g"], p["bn1_b"], relu=True)
    w_taps = _blockdiag_taps(p["conv2_w"], cardinality)   # group-packed weights
    out = conv3x3(out, w_taps, stride=p["stride"])                        # 3x3
    out = batchnorm(out, p["bn2_g"], p["bn2_b"], relu=True)
    out = conv1x1(out, p["conv3_w"])                                      # 1x1
    if "ds_w" in p:
        residual = conv1x1(x, p["ds_w"], stride=p["stride"])
        residual = batchnorm(residual, p["ds_g"], p["ds_b"], relu=False)
    else:
        residual = x
    # bn3 + residual add + relu fused in one Pallas apply kernel
    return batchnorm(out, p["bn3_g"], p["bn3_b"], residual=residual)


def _conv_init(key, cout, cin, kh, kw):
    n = kh * kw * cout
    return jax.random.normal(key, (cout, cin, kh, kw), jnp.float32) * math.sqrt(2.0 / n)


def init_resnext(key, baseWidth, cardinality, layers, num_classes):
    keys = jax.random.split(key, 256)
    kidx = iter(range(256))
    nk = lambda: keys[next(kidx)]
    params = {
        "conv1_w": _conv_init(nk(), 64, 3, 7, 7),
        "bn1_g": jnp.ones((64,), jnp.float32),
        "bn1_b": jnp.zeros((64,), jnp.float32),
    }
    inplanes = 64
    stages = []
    for planes, nblocks, stride in zip((64, 128, 256, 512), layers, (1, 2, 2, 2)):
        blocks = []
        for bidx in range(nblocks):
            s = stride if bidx == 0 else 1
            D = int(math.floor(planes * (baseWidth / 64)))
            DC = D * cardinality
            bp = {
                "stride": s,
                "conv1_w": _conv_init(nk(), DC, inplanes, 1, 1),
                "bn1_g": jnp.ones((DC,), jnp.float32),
                "bn1_b": jnp.zeros((DC,), jnp.float32),
                "conv2_w": _conv_init(nk(), DC, DC // cardinality, 3, 3),
                "bn2_g": jnp.ones((DC,), jnp.float32),
                "bn2_b": jnp.zeros((DC,), jnp.float32),
                "conv3_w": _conv_init(nk(), planes * 4, DC, 1, 1),
                "bn3_g": jnp.ones((planes * 4,), jnp.float32),
                "bn3_b": jnp.zeros((planes * 4,), jnp.float32),
            }
            if bidx == 0 and (s != 1 or inplanes != planes * 4):
                bp["ds_w"] = _conv_init(nk(), planes * 4, inplanes, 1, 1)
                bp["ds_g"] = jnp.ones((planes * 4,), jnp.float32)
                bp["ds_b"] = jnp.zeros((planes * 4,), jnp.float32)
            inplanes = planes * 4
            blocks.append(bp)
        stages.append(blocks)
    params["stages"] = stages
    params["fc_w"] = jax.random.normal(nk(), (num_classes, 512 * 4), jnp.float32) * 0.01
    params["fc_b"] = jnp.zeros((num_classes,), jnp.float32)
    return params


def resnext_forward(x_nchw, params, cardinality):
    x = jnp.transpose(x_nchw, (0, 2, 3, 1)).astype(jnp.bfloat16)  # NCHW -> NHWC
    x = conv_stem(x, params["conv1_w"], stride=2, padding=3)
    x = batchnorm(x, params["bn1_g"], params["bn1_b"], relu=True)
    # MaxPool2d(kernel=3, stride=2, padding=1)
    # TODO(synk): max-pool kept as plain-JAX reduce_window (negligible compute).
    x = jax.lax.reduce_window(
        x, jnp.array(-jnp.inf, dtype=x.dtype), jax.lax.max,
        window_dimensions=(1, 3, 3, 1), window_strides=(1, 2, 2, 1),
        padding=((0, 0), (1, 1), (1, 1), (0, 0)))
    for stage in params["stages"]:
        for bp in stage:
            x = bottleneck(x, bp, cardinality)
    # AvgPool2d(7): final map is exactly 7x7 for a 224x224 input -> global mean.
    x = jnp.mean(x.astype(jnp.float32), axis=(1, 2))              # (N, 2048)
    # FC with bias fused into the matmul epilogue.
    logits = pallas_matmul(x, params["fc_w"].T, bias=params["fc_b"],
                           out_dtype=jnp.float32)
    return logits


if __name__ == "__main__":
    key = jax.random.PRNGKey(0)
    pkey, xkey = jax.random.split(key)
    # Small ResNeXt config: baseWidth=4, cardinality=2, layers=[1,1,1,1].
    baseWidth, cardinality, layers, num_classes = 4, 2, [1, 1, 1, 1], 10
    params = init_resnext(pkey, baseWidth, cardinality, layers, num_classes)
    # 224x224 is the smallest spatial size compatible with AvgPool2d(7).
    x = jax.random.normal(xkey, (2, 3, 224, 224), jnp.float32)    # NCHW, like PyTorch
    out = resnext_forward(x, params, cardinality)
    out = jax.block_until_ready(out)
    assert out.shape == (2, num_classes)
    assert bool(jnp.all(jnp.isfinite(out)))
    print("KERNEL_OK")
</pallas_src>

<mosaic_0001>
module attributes {stable_mosaic.version = 11 : i64} {
  func.func @_matmul_kernel(%arg0: i32, %arg1: i32, %arg2: i32, %arg3: memref<256x147xbf16, #tpu.memory_space<vmem>>, %arg4: memref<147x64xbf16, #tpu.memory_space<vmem>>, %arg5: memref<256x64xbf16, #tpu.memory_space<vmem>>, %arg6: memref<256x64xf32, #tpu.memory_space<vmem>>) attributes {dimension_semantics = [#tpu.dimension_semantics<parallel>, #tpu.dimension_semantics<parallel>, #tpu.dimension_semantics<arbitrary>], iteration_bounds = array<i64: 98, 1, 1>, scalar_prefetch = 0 : i64, scratch_operands = 1 : i64, tpu.core_type = #tpu.core_type<tc>, window_params = [{transform_indices = @transform_0, window_bounds = array<i64: 256, 147>}, {transform_indices = @transform_1, window_bounds = array<i64: 147, 64>}, {transform_indices = @transform_2, window_bounds = array<i64: 256, 64>}]} {
    %c0_i32 = arith.constant 0 : i32
    %0 = arith.cmpi eq, %arg2, %c0_i32 : i32
    %1 = arith.extui %0 : i1 to i32
    %c0_i32_0 = arith.constant 0 : i32
    %2 = arith.cmpi ne, %1, %c0_i32_0 : i32
    scf.if %2 {
      %cst_10 = arith.constant 0.000000e+00 : f32
      %12 = vector.broadcast %cst_10 : f32 to vector<256x64xf32>
      %c0_11 = arith.constant 0 : index
      %c0_12 = arith.constant 0 : index
      %13 = vector.load %arg6[%c0_11, %c0_12] : memref<256x64xf32, #tpu.memory_space<vmem>>, vector<256x64xf32>
      tpu.vector_store %arg6[%c0_11, %c0_12], %12 {strides = array<i32>} : memref<256x64xf32, #tpu.memory_space<vmem>>, vector<256x64xf32>,
    } else {
    }
    %c0 = arith.constant 0 : index
    %c0_1 = arith.constant 0 : index
    %3 = vector.load %arg6[%c0, %c0_1] : memref<256x64xf32, #tpu.memory_space<vmem>>, vector<256x64xf32>
    %c0_2 = arith.constant 0 : index
    %c0_3 = arith.constant 0 : index
    %4 = vector.load %arg3[%c0_2, %c0_3] : memref<256x147xbf16, #tpu.memory_space<vmem>>, vector<256x147xbf16>
    %c0_4 = arith.constant 0 : index
    %c0_5 = arith.constant 0 : index
    %5 = vector.load %arg4[%c0_4, %c0_5] : memref<147x64xbf16, #tpu.memory_space<vmem>>, vector<147x64xbf16>
    %cst = arith.constant dense<0.000000e+00> : vector<256x64xf32>
    %6 = tpu.matmul %4, %5, %cst {dimension_numbers = #tpu.dot_dimension_numbers<[1], [0], [0], [1], [0, 0, 1, 1], [], []>} : vector<256x147xbf16>, vector<147x64xbf16>, vector<256x64xf32> -> vector<256x64xf32>
    %7 = arith.addf %3, %6 : vector<256x64xf32>
    %c0_6 = arith.constant 0 : index
    %c0_7 = arith.constant 0 : index
    %8 = vector.load %arg6[%c0_6, %c0_7] : memref<256x64xf32, #tpu.memory_space<vmem>>, vector<256x64xf32>
    tpu.vector_store %arg6[%c0_6, %c0_7], %7 {strides = array<i32>} : memref<256x64xf32, #tpu.memory_space<vmem>>, vector<256x64xf32>,
    %c0_i32_8 = arith.constant 0 : i32
    %9 = arith.cmpi eq, %arg2, %c0_i32_8 : i32
    %10 = arith.extui %9 : i1 to i32
    %c0_i32_9 = arith.constant 0 : i32
    %11 = arith.cmpi ne, %10, %c0_i32_9 : i32
    scf.if %11 {
      %c0_10 = arith.constant 0 : index
      %c0_11 = arith.constant 0 : index
      %12 = vector.load %arg6[%c0_10, %c0_11] : memref<256x64xf32, #tpu.memory_space<vmem>>, vector<256x64xf32>
      %13 = arith.truncf %12 : vector<256x64xf32> to vector<256x64xbf16>
      %c0_12 = arith.constant 0 : index
      %c0_13 = arith.constant 0 : index
      %14 = vector.load %arg5[%c0_12, %c0_13] : memref<256x64xbf16, #tpu.memory_space<vmem>>, vector<256x64xbf16>
      tpu.vector_store %arg5[%c0_12, %c0_13], %13 {strides = array<i32>} : memref<256x64xbf16, #tpu.memory_space<vmem>>, vector<256x64xbf16>,
    } else {
    }
    return
  }
  func.func @transform_0(%arg0: i32, %arg1: i32, %arg2: i32) -> (i32, i32) {
    %c0_i32 = arith.constant 0 : i32
    return %arg0, %arg2 : i32, i32
  }
  func.func @transform_1(%arg0: i32, %arg1: i32, %arg2: i32) -> (i32, i32) {
    %c0_i32 = arith.constant 0 : i32
    return %arg2, %arg1 : i32, i32
  }
  func.func @transform_2(%arg0: i32, %arg1: i32, %arg2: i32) -> (i32, i32) {
    %c0_i32 = arith.constant 0 : i32
    return %arg0, %arg1 : i32, i32
  }
}

</mosaic_0001>

<bundles_post_ra>
// kernel: tpu_custom_call.1
= control target key start
LH: loop header
LB: loop body
LE: loop exit
PB: predicated region body
PF: predicated region fallthrough
CT: control target
= control target key end

     0   :  { %7 = vsyncpa [#allocation4], 0  ;;  %s1864_s0 = inlined_call_operand.vmem [shape: bf16[25088,147], index: 0, kind: input, shape index: {}]   ;;  %s1865_s1 = inlined_call_operand.vmem [shape: bf16[147,64], index: 1, kind: input, shape index: {}]   ;;  %s1866_s2 = inlined_call_operand.hbm [shape: bf16[25088,64], index: 2, kind: output, shape index: {}]  }
   0x1   :  { %9 = vsyncpa [#allocation4 + $0x1], 0  ;;  %s1510_s9 = smov 0   ;;  %s1512_s10 = smov 0  }
   0x2   :  { %s1514_s11 = smov 0   ;;  %s1516_s12 = smov 0  }
   0x3   :  { %s1518_s13 = smov 0   ;;  %s1520_s14 = smov 0  }
   0x4 LB: > { %s1132_s15 = sadd.s32 4294967295, %s1487_s14   ;;  %s1133_s16 = sadd.s32 4294967294, %s1487_s14   ;;  %s1487_s14 = sphi %s1520_s14, %s15_s14   ;;  %s1483_s13 = sphi %s1518_s13, %s1873_s13   ;;  %s1479_s12 = sphi %s1516_s12, %s1872_s12   ;;  %s1475_s11 = sphi %s1514_s11, %s1871_s11   ;;  %s1471_s10 = sphi %s1512_s10, %s1870_s10   ;;  %s1467_s9 = sphi %s1510_s9, %s1869_s9  }
   0x5   : > { %s34_s17 = sadd.s32 1, %s1483_s13  ;;  %s99_s18 = sadd.s32 1, %s1475_s11 }
   0x6   : > { %p36_p0 = scmp.ge.s32.totalorder %s34_s17, 98  ;;  %p109_p1 = scmp.ne.s32.totalorder %s1475_s11, %s1471_s10 }
   0x7   : > { %p110_p2 = scmp.eq.s32.totalorder %s1132_s15, 97  ;;  %p115_p3 = scmp.ne.s32.totalorder %s1471_s10, %s1467_s9 }
   0x8   : > { %s1875_s17 = smov (%p36_p0, %s34_s17), 0  ;;  %p116_p5 = scmp.eq.s32.totalorder %s1133_s16, 97 }
   0x9   : > { %p1550_p4 = por %p110_p2, %p109_p1  ;;  %s94_s20 = ssub.s32 %s1483_s13, %s1875_s17 }
   0xa   : > { %p1137_p6 = scmp.ge.s32.totalorder %s1487_s14, 1  ;;  %p97_p7 = scmp.eq.s32.totalorder %s94_s20, 0 }
   0xb   : > { %p1557_p8 = por %p116_p5, %p115_p3  ;;  %p161_p9 = scmp.lt.s32.totalorder %s1487_s14, 99 }
   0xc   : > { %s1563_s22 = scalar_select %p97_p7, %s1475_s11, %s99_s18  }
   0xd   : > { %p162_p10 = pnand %p1137_p6, %p161_p9 }
   0xe   : > { %v1351_v0 = vld [vmem:[%s1865_s1] sm:$0xff] (!%p162_p10)   ;;  %v1489_v1 = vmov (!%p162_p10), 0   ;;  %v1352_v2 = vld [vmem:[%s1865_s1 + $0x8] sm:$0xff] (!%p162_p10)   ;;  %v1353_v3 = vld [vmem:[%s1865_s1 + $0x10] sm:$0xff] (!%p162_p10)   ;;  %s1139_s29 = sshll.u32 (!%p162_p10), %s1479_s12, 5  ;;  %vm223_vm0 = vcmask (!%p162_p10), 523264  }
   0xf   : > { %165 = sbr.rel (%p162_p10) target bundleno = 355 (0x163), region = 28  ;;  %596 = vmatprep.subr.bf16.mxu0 (!%p162_p10), %v1489_v1  ;;  %1271 = vmatprep.subr.bf16.mxu1 (!%p162_p10), %v1489_v1  ;;  %p198_p11 = scmp.lt.s32.totalorder (!%p162_p10), %s1139_s29, 3135  ;;  %v1354_v4 = vld [vmem:[%s1865_s1 + $0x18] sm:$0xff] (!%p162_p10)   ;;  %v1490_v5 = vmov (!%p162_p10), 0.0   ;;  %v1355_v6 = vld [vmem:[%s1865_s1 + $0x20] sm:$0xff] (!%p162_p10)   ;;  %vm540_vm1 = vcmask (!%p162_p10), 154624  }
  0x10   : > { %597 = vmatpush1.bf16.msra.mxu0 (!%p162_p10), %v1351_v0  ;;  %1281 = vmatpush1.bf16.msra.mxu1 (!%p162_p10), %v1351_v0  ;;  %224 = vst.msk [vmem:[#allocation2] sm:$0xff] (!%p162_p10), %vm223_vm0, %v1490_v5  ;;  %225 = vst.msk [vmem:[#allocation2 + $0x8] sm:$0xff] (!%p162_p10), %vm223_vm0, %v1490_v5  ;;  %v1356_v9 = vld [vmem:[%s1865_s1 + $0x28] sm:$0xff] (!%p162_p10)   ;;  %v1357_v10 = vld [vmem:[%s1865_s1 + $0x30] sm:$0xff] (!%p162_p10)   ;;  %vm589_vm2 = vcmask (!%p162_p10), 1040384   ;;  %vm590_vm3 = vcmask (!%p162_p10), 1041408  }
  0x11   : > { %598 = vmatprep.subr.bf16.mxu0 (!%p162_p10), %v1489_v1  ;;  %1272 = vmatprep.subr.bf16.mxu1 (!%p162_p10), %v1489_v1  ;;  %226 = vst.msk [vmem:[#allocation2 + $0x10] sm:$0xff] (!%p162_p10), %vm223_vm0, %v1490_v5  ;;  %227 = vst.msk [vmem:[#allocation2 + $0x18] sm:$0xff] (!%p162_p10), %vm223_vm0, %v1490_v5  ;;  %v1358_v11 = vld [vmem:[%s1865_s1 + $0x38] sm:$0xff] (!%p162_p10)   ;;  %v1491_v12 = vmov (!%p162_p10), 65535   ;;  %v1359_v14 = vld [vmem:[%s1865_s1 + $0x40] sm:$0xff] (!%p162_p10)   ;;  %s193_s30 = sand.u32 (!%p162_p10), 1, %s1471_s10  }
  0x12   : > { %228 = vst.msk [vmem:[#allocation2 + $0x20] sm:$0xff] (!%p162_p10), %vm223_vm0, %v1490_v5  ;;  %229 = vst.msk [vmem:[#allocation2 + $0x28] sm:$0xff] (!%p162_p10), %vm223_vm0, %v1490_v5  ;;  %v591_v13 = vsel (!%p162_p10), %vm589_vm2, 4294967295, %v1491_v12  ;;  %v1360_v15 = vld [vmem:[%s1865_s1 + $0x48] ss:$0 sps:$4 sm:$0x33] (!%p162_p10)  }
  0x13   : > { %230 = vst.msk [vmem:[#allocation2 + $0x30] sm:$0xff] (!%p162_p10), %vm223_vm0, %v1490_v5  ;;  %231 = vst.msk [vmem:[#allocation2 + $0x38] sm:$0xff] (!%p162_p10), %vm223_vm0, %v1490_v5  ;;  %v592_v16 = vsel (!%p162_p10), %vm590_vm3, %v591_v13, 0  ;;  %s1138_s3 = sshll.u32 (!%p162_p10), %s193_s30, 7  ;;  %vm985_vm4 = vcmask (!%p162_p10), 519168   ;;  %s1270_s5 = sshll.u32 (!%p162_p10), %s1479_s12, 11 }
  0x14   : > { %599 = vmatpush1.bf16.msra.mxu0 (!%p162_p10), %v1352_v2  ;;  %1282 = vmatpush1.bf16.msra.mxu1 (!%p162_p10), %v1352_v2  ;;  %232 = vst.msk [vmem:[#allocation2 + $0x40] sm:$0xff] (!%p162_p10), %vm223_vm0, %v1490_v5  ;;  %233 = vst.msk [vmem:[#allocation2 + $0x48] sm:$0xff] (!%p162_p10), %vm223_vm0, %v1490_v5  ;;  %v594_v17 = vand.u32 (!%p162_p10), %v1360_v15, %v592_v16  ;;  %s1804_s15 = scalar_lea.hbm (!%p162_p10), %s1866_s2, %s1270_s5  ;;  %s1818_s12 = scalar_lea.sflag (!%p162_p10), [#allocation4], %s193_s30 }
  0x15   : > { %600 = vmatprep.subr.bf16.mxu0 (!%p162_p10), %v1489_v1  ;;  %1273 = vmatprep.subr.bf16.mxu1 (!%p162_p10), %v1489_v1  ;;  %234 = vst.msk [vmem:[#allocation2 + $0x50] sm:$0xff] (!%p162_p10), %vm223_vm0, %v1490_v5  ;;  %235 = vst.msk [vmem:[#allocation2 + $0x58] sm:$0xff] (!%p162_p10), %vm223_vm0, %v1490_v5  ;;  %s1492_s18 = smov (!%p162_p10), [#allocation3]  }
  0x16   : > { %s1877_s29 = smov (!%p198_p11, %s1139_s29), 3135  ;;  %236 = vst.msk [vmem:[#allocation2 + $0x60] sm:$0xff] %vm223_vm0, %v1490_v5  ;;  %237 = vst.msk [vmem:[#allocation2 + $0x68] sm:$0xff] %vm223_vm0, %v1490_v5  ;;  %s1413_s20 = sshll.u32 %s1492_s18, 4  ;;  %s1414_s20 = int_to_ptr.vmem [resolvable:$false] %s1413_s20 }
  0x17   : > { %s1237_s4 = sshll.u32 %s1877_s29, 3  ;;  %238 = vst.msk [vmem:[#allocation2 + $0x70] sm:$0xff] %vm223_vm0, %v1490_v5  ;;  %239 = vst.msk [vmem:[#allocation2 + $0x78] sm:$0xff] %vm223_vm0, %v1490_v5  ;;  %v256_v48 = vld [vmem:[#allocation2] sm:$0xff]  ;;  %v257_v52 = vld [vmem:[#allocation2 + $0x8] sm:$0xff]  ;;  %s1415_s23 = scalar_lea.vmem %s1414_s20, 4096 }
  0x18   : > { %601 = vmatpush1.bf16.msra.mxu0 %v1353_v3  ;;  %1283 = vmatpush1.bf16.msra.mxu1 %v1353_v3  ;;  %240 = vst.msk [vmem:[#allocation2 + $0x80] sm:$0xff] %vm223_vm0, %v1490_v5  ;;  %241 = vst.msk [vmem:[#allocation2 + $0x88] sm:$0xff] %vm223_vm0, %v1490_v5  ;;  %s1626_s7 = scalar_lea.vmem %s1864_s0, %s1237_s4  ;;  %v258_v0 = vld [vmem:[#allocation2 + $0x10] sm:$0xff]  ;;  %s1715_s4 = scalar_lea.vmem [#allocation3], %s1138_s3 }
  0x19   : > { %602 = vmatprep.subr.bf16.mxu0 %v1489_v1  ;;  %1274 = vmatprep.subr.bf16.mxu1 %v1489_v1  ;;  %242 = vst.msk [vmem:[#allocation2 + $0x90] sm:$0xff] %vm223_vm0, %v1490_v5  ;;  %243 = vst.msk [vmem:[#allocation2 + $0x98] sm:$0xff] %vm223_vm0, %v1490_v5  ;;  %v1363_v7 = vld [vmem:[%s1626_s7 + $0x4] ss:$8 sps:$4 sm:$0xff]   ;;  %v1361_v18 = vld [vmem:[%s1626_s7] ss:$8 sps:$4 sm:$0xff]  }
  0x1a   : > { %244 = vst.msk [vmem:[#allocation2 + $0xa0] sm:$0xff] %vm223_vm0, %v1490_v5  ;;  %245 = vst.msk [vmem:[#allocation2 + $0xa8] sm:$0xff] %vm223_vm0, %v1490_v5  ;;  %v1366_v8 = vld [vmem:[%s1626_s7 + $0x84] ss:$8 sps:$4 sm:$0xff]   ;;  %1184 = vmatprep.mubr.msk.bf16.mxu0 %vm540_vm1, %v1363_v7  ;;  %v1364_v19 = vld [vmem:[%s1626_s7 + $0x80] ss:$8 sps:$4 sm:$0xff]  }
  0x1b   : > { %246 = vst.msk [vmem:[#allocation2 + $0xb0] sm:$0xff] %vm223_vm0, %v1490_v5  ;;  %247 = vst.msk [vmem:[#allocation2 + $0xb8] sm:$0xff] %vm223_vm0, %v1490_v5  ;;  %1192 = vmatprep.mubr.msk.bf16.mxu1 %vm540_vm1, %v1366_v8  ;;  %v1367_v20 = vld [vmem:[%s1626_s7 + $0x14] ss:$8 sps:$4 sm:$0xff]   ;;  %v1371_v22 = vld [vmem:[%s1626_s7 + $0x10] ss:$8 sps:$4 sm:$0xff]  }
  0x1c   : > { %248 = vst.msk [vmem:[#allocation2 + $0xc0] sm:$0xff] %vm223_vm0, %v1490_v5  ;;  %249 = vst.msk [vmem:[#allocation2 + $0xc8] sm:$0xff] %vm223_vm0, %v1490_v5  ;;  %603 = vmatpush1.bf16.msra.mxu0 %v1354_v4  ;;  %1284 = vmatpush1.bf16.msra.mxu1 %v1354_v4  ;;  %v1369_v21 = vld [vmem:[%s1626_s7 + $0x94] ss:$8 sps:$4 sm:$0xff]   ;;  %v1372_v23 = vld [vmem:[%s1626_s7 + $0x90] ss:$8 sps:$4 sm:$0xff]  }
  0x1d   : > { %250 = vst.msk [vmem:[#allocation2 + $0xd0] sm:$0xff] %vm223_vm0, %v1490_v5  ;;  %251 = vst.msk [vmem:[#allocation2 + $0xd8] sm:$0xff] %vm223_vm0, %v1490_v5  ;;  %604 = vmatprep.subr.bf16.mxu0 %v1489_v1  ;;  %1275 = vmatprep.subr.bf16.mxu1 %v1489_v1  ;;  %v1373_v24 = vld [vmem:[%s1626_s7 + $0x24] ss:$8 sps:$4 sm:$0xff]   ;;  %v1377_v26 = vld [vmem:[%s1626_s7 + $0x20] ss:$8 sps:$4 sm:$0xff]  }
  0x1e   : > { %252 = vst.msk [vmem:[#allocation2 + $0xe0] sm:$0xff] %vm223_vm0, %v1490_v5  ;;  %253 = vst.msk [vmem:[#allocation2 + $0xe8] sm:$0xff] %vm223_vm0, %v1490_v5  ;;  %v1375_v25 = vld [vmem:[%s1626_s7 + $0xa4] ss:$8 sps:$4 sm:$0xff]   ;;  %v1378_v27 = vld [vmem:[%s1626_s7 + $0xa0] ss:$8 sps:$4 sm:$0xff]  }
  0x1f   : > { %254 = vst.msk [vmem:[#allocation2 + $0xf0] sm:$0xff] %vm223_vm0, %v1490_v5  ;;  %255 = vst.msk [vmem:[#allocation2 + $0xf8] sm:$0xff] %vm223_vm0, %v1490_v5  ;;  %v1379_v28 = vld [vmem:[%s1626_s7 + $0x34] ss:$8 sps:$4 sm:$0xff]   ;;  %v1383_v30 = vld [vmem:[%s1626_s7 + $0x30] ss:$8 sps:$4 sm:$0xff]  }
  0x20   : > { %605 = vmatpush1.bf16.msra.mxu0 %v1355_v6  ;;  %1285 = vmatpush1.bf16.msra.mxu1 %v1355_v6  ;;  %v1381_v29 = vld [vmem:[%s1626_s7 + $0xb4] ss:$8 sps:$4 sm:$0xff]   ;;  %v1384_v31 = vld [vmem:[%s1626_s7 + $0xb0] ss:$8 sps:$4 sm:$0xff]   ;;  %v1385_v32 = vld [vmem:[%s1626_s7 + $0x44] ss:$8 sps:$4 sm:$0xff]  }
  0x21   : > { %606 = vmatprep.subr.bf16.mxu0 %v1489_v1  ;;  %1276 = vmatprep.subr.bf16.mxu1 %v1489_v1  ;;  %v1387_v33 = vld [vmem:[%s1626_s7 + $0xc4] ss:$8 sps:$4 sm:$0xff]   ;;  %v1389_v34 = vld [vmem:[%s1626_s7 + $0x40] ss:$8 sps:$4 sm:$0xff]   ;;  %v1391_v36 = vld [vmem:[%s1626_s7 + $0x54] ss:$8 sps:$4 sm:$0xff]  }
  0x22   : > { %v1390_v35 = vld [vmem:[%s1626_s7 + $0xc0] ss:$8 sps:$4 sm:$0xff]   ;;  %v1393_v37 = vld [vmem:[%s1626_s7 + $0xd4] ss:$8 sps:$4 sm:$0xff]   ;;  %v1395_v38 = vld [vmem:[%s1626_s7 + $0x50] ss:$8 sps:$4 sm:$0xff]  }
  0x23   : > { %v1396_v39 = vld [vmem:[%s1626_s7 + $0xd0] ss:$8 sps:$4 sm:$0xff]   ;;  %v1397_v40 = vld [vmem:[%s1626_s7 + $0x64] ss:$8 sps:$4 sm:$0xff]   ;;  %v1401_v42 = vld [vmem:[%s1626_s7 + $0x60] ss:$8 sps:$4 sm:$0xff]  }
  0x24   : > { %607 = vmatpush1.bf16.msra.mxu0 %v1356_v9  ;;  %1286 = vmatpush1.bf16.msra.mxu1 %v1356_v9  ;;  %v1399_v41 = vld [vmem:[%s1626_s7 + $0xe4] ss:$8 sps:$4 sm:$0xff]   ;;  %v1402_v43 = vld [vmem:[%s1626_s7 + $0xe0] ss:$8 sps:$4 sm:$0xff]   ;;  %v1403_v44 = vld [vmem:[%s1626_s7 + $0x74] ss:$8 sps:$4 sm:$0xff]  }
  0x25   : > { %608 = vmatprep.subr.bf16.mxu0 %v1489_v1  ;;  %1277 = vmatprep.subr.bf16.mxu1 %v1489_v1  ;;  %v1405_v45 = vld [vmem:[%s1626_s7 + $0xf4] ss:$8 sps:$4 sm:$0xff]   ;;  %v1407_v46 = vld [vmem:[%s1626_s7 + $0x70] ss:$8 sps:$4 sm:$0xff]   ;;  %v272_v49 = vld [vmem:[#allocation2 + $0x80] sm:$0xff]  ;;  %s1033_s6 = sshll.u32 %s1715_s4, 4  ;;  %s1806_s6 = int_to_ptr.vmem [resolvable:$true] %s1033_s6 }
  0x26   : > { %v1408_v47 = vld [vmem:[%s1626_s7 + $0xf0] ss:$8 sps:$4 sm:$0xff]   ;;  %v273_v53 = vld [vmem:[#allocation2 + $0x88] sm:$0xff]  ;;  %s1409_s16 = scalar_lea.vmem %s1806_s6, 2048  ;;  %p1416_p1 = scmp.lt.s32.totalorder %s1806_s6, %s1414_s20 }
  0x27   : > { %v259_v4 = vld [vmem:[#allocation2 + $0x18] sm:$0xff]  ;;  %p1410_p12 = scmp.ne.s32.totalorder %s1806_s6, %s1409_s16  ;;  %p1417_p2 = scmp.lt.s32.totalorder %s1415_s23, %s1409_s16 }
  0x28   : > { %609 = vmatpush1.bf16.msra.mxu0 %v1357_v10  ;;  %1287 = vmatpush1.bf16.msra.mxu1 %v1357_v10  ;;  %v275_v5 = vld [vmem:[#allocation2 + $0x98] sm:$0xff] }
  0x29   : > { %610 = vmatprep.subr.bf16.mxu0 %v1489_v1  ;;  %1278 = vmatprep.subr.bf16.mxu1 %v1489_v1  ;;  %p1411_p13 = pnand %p1410_p12, %p1550_p4  ;;  %p1418_p3 = por %p1417_p2, %p1416_p1 }
  0x2b   : > { %p1412_p0 = pneg %p1411_p13 }
  0x2c   : > { %611 = vmatpush1.bf16.msra.mxu0 %v1358_v11  ;;  %1288 = vmatpush1.bf16.msra.mxu1 %v1358_v11 }
  0x2d   : > { %612 = vmatprep.subr.bf16.mxu0 %v1489_v1  ;;  %1279 = vmatprep.subr.bf16.mxu1 %v1489_v1  ;;  %p1419_p5 = pnand %p1418_p3, %p1412_p0 }
  0x30   : > { %613 = vmatpush1.bf16.msra.mxu0 %v1359_v14  ;;  %1289 = vmatpush1.bf16.msra.mxu1 %v1359_v14 }
  0x31   : > { %614 = vmatprep.subr.bf16.mxu0 %v1489_v1  ;;  %1280 = vmatprep.subr.bf16.mxu1 %v1489_v1  ;;  %v274_v1 = vld [vmem:[#allocation2 + $0x90] sm:$0xff] }
  0x34   : > { %615 = vmatpush1.bf16.msra.mxu0 %v594_v17  ;;  %1290 = vmatpush1.bf16.msra.mxu1 %v594_v17 }
  0x37   : > { %629 = vmatmul.mubr.bf16.vlgmr.msra.gmra.mrb[0].mxu0 %v1361_v18  ;;  %693 = vmatmul.mubr.bf16.vlgmr.msra.gmra.mrb[0].mxu1 %v1364_v19 }
  0x38   : > { %1185 = vmatprep.mubr.msk.bf16.mxu0 %vm540_vm1, %v1367_v20  ;;  %1193 = vmatprep.mubr.msk.bf16.mxu1 %vm540_vm1, %v1369_v21 }
  0x3f   : > { %637 = vmatmul.mubr.bf16.gmra.mrb[4].mxu0 %v1371_v22  ;;  %701 = vmatmul.mubr.bf16.gmra.mrb[4].mxu1 %v1372_v23 }
  0x40   : > { %1186 = vmatprep.mubr.msk.bf16.mxu0 %vm540_vm1, %v1373_v24  ;;  %1194 = vmatprep.mubr.msk.bf16.mxu1 %vm540_vm1, %v1375_v25  ;;  %v260_v24 = vld [vmem:[#allocation2 + $0x20] sm:$0xff] }
  0x41   : > { %v276_v25 = vld [vmem:[#allocation2 + $0xa0] sm:$0xff] }
  0x47   : > { %645 = vmatmul.mubr.bf16.gmra.mrb[8].mxu0 %v1377_v26  ;;  %709 = vmatmul.mubr.bf16.gmra.mrb[8].mxu1 %v1378_v27 }
  0x48   : > { %1187 = vmatprep.mubr.msk.bf16.mxu0 %vm540_vm1, %v1379_v28  ;;  %1195 = vmatprep.mubr.msk.bf16.mxu1 %vm540_vm1, %v1381_v29  ;;  %v261_v28 = vld [vmem:[#allocation2 + $0x28] sm:$0xff] }
  0x49   : > { %v277_v29 = vld [vmem:[#allocation2 + $0xa8] sm:$0xff] }
  0x4f   : > { %653 = vmatmul.mubr.bf16.gmra.mrb[12].mxu0 %v1383_v30  ;;  %717 = vmatmul.mubr.bf16.gmra.mrb[12].mxu1 %v1384_v31 }
  0x50   : > { %1188 = vmatprep.mubr.msk.bf16.mxu0 %vm540_vm1, %v1385_v32  ;;  %1196 = vmatprep.mubr.msk.bf16.mxu1 %vm540_vm1, %v1387_v33 }
  0x57   : > { %661 = vmatmul.mubr.bf16.gmra.mrb[16].mxu0 %v1389_v34  ;;  %725 = vmatmul.mubr.bf16.gmra.mrb[16].mxu1 %v1390_v35 }
  0x58   : > { %1189 = vmatprep.mubr.msk.bf16.mxu0 %vm540_vm1, %v1391_v36  ;;  %1197 = vmatprep.mubr.msk.bf16.mxu1 %vm540_vm1, %v1393_v37 }
  0x5f   : > { %669 = vmatmul.mubr.bf16.gmra.mrb[20].mxu0 %v1395_v38  ;;  %733 = vmatmul.mubr.bf16.gmra.mrb[20].mxu1 %v1396_v39 }
  0x60   : > { %1190 = vmatprep.mubr.msk.bf16.mxu0 %vm540_vm1, %v1397_v40  ;;  %1198 = vmatprep.mubr.msk.bf16.mxu1 %vm540_vm1, %v1399_v41 }
  0x67   : > { %677 = vmatmul.mubr.bf16.gmra.mrb[24].mxu0 %v1401_v42  ;;  %741 = vmatmul.mubr.bf16.gmra.mrb[24].mxu1 %v1402_v43 }
  0x68   : > { %1191 = vmatprep.mubr.msk.bf16.mxu0 %vm540_vm1, %v1403_v44  ;;  %1199 = vmatprep.mubr.msk.bf16.mxu1 %vm540_vm1, %v1405_v45 }
  0x6f   : > { %685 = vmatmul.mubr.bf16.gmra.mrb[28].mxu0 %v1407_v46  ;;  %749 = vmatmul.mubr.bf16.gmra.mrb[28].mxu1 %v1408_v47 }
 0x10a   : > { %v630_v50 = vpop.f32.mrb[0].mxu0  ;;  %v694_v51 = vpop.f32.mrb[0].mxu1 }
 0x10b   : > { %v757_v54 = vadd.f32 %v630_v50, %v256_v48  ;;  %v773_v55 = vadd.f32 %v694_v51, %v272_v49  ;;  %v632_v56 = vpop.f32.mrb[1].mxu0  ;;  %v696_v57 = vpop.f32.mrb[1].mxu1  ;;  %v262_v48 = vld [vmem:[#allocation2 + $0x30] sm:$0xff] }
 0x10c   : > { %v633_v58 = vpop.f32.mrb[2].mxu0  ;;  %v697_v59 = vpop.f32.mrb[2].mxu1  ;;  %v278_v49 = vld [vmem:[#allocation2 + $0xb0] sm:$0xff] }
 0x10d   : > { %790 = vst.msk [vmem:[#allocation2] sm:$0xff] %vm223_vm0, %v757_v54  ;;  %806 = vst.msk [vmem:[#allocation2 + $0x80] sm:$0xff] %vm223_vm0, %v773_v55  ;;  %v758_v60 = vadd.f32 %v633_v58, %v257_v52  ;;  %v774_v61 = vadd.f32 %v697_v59, %v273_v53  ;;  %v635_v62 = vpop.f32.mrb[3].mxu0  ;;  %v699_v63 = vpop.f32.mrb[3].mxu1  ;;  %v263_v52 = vld [vmem:[#allocation2 + $0x38] sm:$0xff] }
 0x10e   : > { %v279_v53 = vld [vmem:[#allocation2 + $0xb8] sm:$0xff] }
 0x10f   : > { %791 = vst.msk [vmem:[#allocation2 + $0x8] sm:$0xff] %vm223_vm0, %v758_v60  ;;  %807 = vst.msk [vmem:[#allocation2 + $0x88] sm:$0xff] %vm223_vm0, %v774_v61 }
 0x112   : > { %v638_v2 = vpop.f32.mrb[4].mxu0  ;;  %v702_v3 = vpop.f32.mrb[4].mxu1 }
 0x113   : > { %v759_v6 = vadd.f32 %v638_v2, %v258_v0  ;;  %v775_v7 = vadd.f32 %v702_v3, %v274_v1  ;;  %v640_v8 = vpop.f32.mrb[5].mxu0  ;;  %v704_v9 = vpop.f32.mrb[5].mxu1 }
 0x114   : > { %v825_v10 = vld [vmem:[#allocation2] sm:$0xff]  ;;  %v641_v12 = vpop.f32.mrb[6].mxu0  ;;  %v705_v13 = vpop.f32.mrb[6].mxu1 }
 0x115   : > { %v841_v11 = vld [vmem:[#allocation2 + $0x80] sm:$0xff]  ;;  %v1238_v14 = vpack.c.bf16 %v825_v10, %v825_v10  ;;  %792 = vst.msk [vmem:[#allocation2 + $0x10] sm:$0xff] %vm223_vm0, %v759_v6  ;;  %808 = vst.msk [vmem:[#allocation2 + $0x90] sm:$0xff] %vm223_vm0, %v775_v7  ;;  %v760_v16 = vadd.f32 %v641_v12, %v259_v4  ;;  %v776_v17 = vadd.f32 %v705_v13, %v275_v5  ;;  %v643_v18 = vpop.f32.mrb[7].mxu0  ;;  %v707_v19 = vpop.f32.mrb[7].mxu1  ;;  %v265_v12 = vld [vmem:[#allocation2 + $0x48] sm:$0xff] }
 0x116   : > { %v1254_v15 = vpack.c.bf16 %v841_v11, %v841_v11  ;;  %v826_v20 = vld [vmem:[#allocation2 + $0x8] sm:$0xff]  ;;  %v264_v8 = vld [vmem:[#allocation2 + $0x40] sm:$0xff] }
 0x117   : > { %v842_v21 = vld [vmem:[#allocation2 + $0x88] sm:$0xff]  ;;  %986 = vst.msk [vmem:[%s1715_s4] sm:$0xf] %vm985_vm4, %v1238_v14  ;;  %v1239_v22 = vpack.c.bf16 %v826_v20, %v826_v20  ;;  %v280_v9 = vld [vmem:[#allocation2 + $0xc0] sm:$0xff] }
 0x118   : > { %1002 = vst.msk [vmem:[%s1715_s4 + $0x40] sm:$0xf] %vm985_vm4, %v1254_v15  ;;  %v1255_v23 = vpack.c.bf16 %v842_v21, %v842_v21  ;;  %v281_v13 = vld [vmem:[#allocation2 + $0xc8] sm:$0xff] }
 0x119   : > { %793 = vst.msk [vmem:[#allocation2 + $0x18] sm:$0xff] %vm223_vm0, %v760_v16  ;;  %809 = vst.msk [vmem:[#allocation2 + $0x98] sm:$0xff] %vm223_vm0, %v776_v17 }
 0x11a   : > { %987 = vst.msk [vmem:[%s1715_s4 + $0x4] sm:$0xf] %vm985_vm4, %v1239_v22  ;;  %1003 = vst.msk [vmem:[%s1715_s4 + $0x44] sm:$0xf] %vm985_vm4, %v1255_v23  ;;  %v646_v26 = vpop.f32.mrb[8].mxu0  ;;  %v710_v27 = vpop.f32.mrb[8].mxu1 }
 0x11b   : > { %v761_v30 = vadd.f32 %v646_v26, %v260_v24  ;;  %v777_v31 = vadd.f32 %v710_v27, %v276_v25  ;;  %v648_v32 = vpop.f32.mrb[9].mxu0  ;;  %v712_v33 = vpop.f32.mrb[9].mxu1 }
 0x11c   : > { %v827_v34 = vld [vmem:[#allocation2 + $0x10] sm:$0xff]  ;;  %v649_v36 = vpop.f32.mrb[10].mxu0  ;;  %v713_v37 = vpop.f32.mrb[10].mxu1 }
 0x11d   : > { %v843_v35 = vld [vmem:[#allocation2 + $0x90] sm:$0xff]  ;;  %v1240_v38 = vpack.c.bf16 %v827_v34, %v827_v34  ;;  %794 = vst.msk [vmem:[#allocation2 + $0x20] sm:$0xff] %vm223_vm0, %v761_v30  ;;  %810 = vst.msk [vmem:[#allocation2 + $0xa0] sm:$0xff] %vm223_vm0, %v777_v31  ;;  %v762_v40 = vadd.f32 %v649_v36, %v261_v28  ;;  %v778_v41 = vadd.f32 %v713_v37, %v277_v29  ;;  %v651_v42 = vpop.f32.mrb[11].mxu0  ;;  %v715_v43 = vpop.f32.mrb[11].mxu1  ;;  %v267_v36 = vld [vmem:[#allocation2 + $0x58] sm:$0xff] }
 0x11e   : > { %v1256_v39 = vpack.c.bf16 %v843_v35, %v843_v35  ;;  %v266_v32 = vld [vmem:[#allocation2 + $0x50] sm:$0xff]  ;;  %v283_v37 = vld [vmem:[#allocation2 + $0xd8] sm:$0xff] }
 0x11f   : > { %988 = vst.msk [vmem:[%s1715_s4 + $0x8] sm:$0xf] %vm985_vm4, %v1240_v38  ;;  %v282_v33 = vld [vmem:[#allocation2 + $0xd0] sm:$0xff] }
 0x120   : > { %v828_v44 = vld [vmem:[#allocation2 + $0x18] sm:$0xff]  ;;  %1004 = vst.msk [vmem:[%s1715_s4 + $0x48] sm:$0xf] %vm985_vm4, %v1256_v39 }
 0x121   : > { %v844_v45 = vld [vmem:[#allocation2 + $0x98] sm:$0xff]  ;;  %v1241_v46 = vpack.c.bf16 %v828_v44, %v828_v44  ;;  %795 = vst.msk [vmem:[#allocation2 + $0x28] sm:$0xff] %vm223_vm0, %v762_v40  ;;  %811 = vst.msk [vmem:[#allocation2 + $0xa8] sm:$0xff] %vm223_vm0, %v778_v41 }
 0x122   : > { %v1257_v47 = vpack.c.bf16 %v844_v45, %v844_v45  ;;  %v654_v50 = vpop.f32.mrb[12].mxu0  ;;  %v718_v51 = vpop.f32.mrb[12].mxu1 }
 0x123   : > { %989 = vst.msk [vmem:[%s1715_s4 + $0xc] sm:$0xf] %vm985_vm4, %v1241_v46  ;;  %v763_v54 = vadd.f32 %v654_v50, %v262_v48  ;;  %v779_v55 = vadd.f32 %v718_v51, %v278_v49  ;;  %v656_v56 = vpop.f32.mrb[13].mxu0  ;;  %v720_v57 = vpop.f32.mrb[13].mxu1 }
 0x124   : > { %1005 = vst.msk [vmem:[%s1715_s4 + $0x4c] sm:$0xf] %vm985_vm4, %v1257_v47  ;;  %v829_v58 = vld [vmem:[#allocation2 + $0x20] sm:$0xff]  ;;  %v657_v60 = vpop.f32.mrb[14].mxu0  ;;  %v721_v61 = vpop.f32.mrb[14].mxu1 }
 0x125   : > { %v845_v59 = vld [vmem:[#allocation2 + $0xa0] sm:$0xff]  ;;  %v1242_v62 = vpack.c.bf16 %v829_v58, %v829_v58  ;;  %796 = vst.msk [vmem:[#allocation2 + $0x30] sm:$0xff] %vm223_vm0, %v763_v54  ;;  %812 = vst.msk [vmem:[#allocation2 + $0xb0] sm:$0xff] %vm223_vm0, %v779_v55  ;;  %v764_v0 = vadd.f32 %v657_v60, %v263_v52  ;;  %v780_v1 = vadd.f32 %v721_v61, %v279_v53  ;;  %v659_v2 = vpop.f32.mrb[15].mxu0  ;;  %v723_v3 = vpop.f32.mrb[15].mxu1  ;;  %v269_v60 = vld [vmem:[#allocation2 + $0x68] sm:$0xff] }
 0x126   : > { %v1258_v63 = vpack.c.bf16 %v845_v59, %v845_v59  ;;  %v268_v56 = vld [vmem:[#allocation2 + $0x60] sm:$0xff]  ;;  %v285_v61 = vld [vmem:[#allocation2 + $0xe8] sm:$0xff] }
 0x127   : > { %990 = vst.msk [vmem:[%s1715_s4 + $0x10] sm:$0xf] %vm985_vm4, %v1242_v62  ;;  %v284_v57 = vld [vmem:[#allocation2 + $0xe0] sm:$0xff] }
 0x128   : > { %v830_v4 = vld [vmem:[#allocation2 + $0x28] sm:$0xff]  ;;  %1006 = vst.msk [vmem:[%s1715_s4 + $0x50] sm:$0xf] %vm985_vm4, %v1258_v63 }
 0x129   : > { %v846_v5 = vld [vmem:[#allocation2 + $0xa8] sm:$0xff]  ;;  %v1243_v6 = vpack.c.bf16 %v830_v4, %v830_v4  ;;  %797 = vst.msk [vmem:[#allocation2 + $0x38] sm:$0xff] %vm223_vm0, %v764_v0  ;;  %813 = vst.msk [vmem:[#allocation2 + $0xb8] sm:$0xff] %vm223_vm0, %v780_v1 }
 0x12a   : > { %v1259_v7 = vpack.c.bf16 %v846_v5, %v846_v5  ;;  %v662_v10 = vpop.f32.mrb[16].mxu0  ;;  %v726_v11 = vpop.f32.mrb[16].mxu1 }
 0x12b   : > { %991 = vst.msk [vmem:[%s1715_s4 + $0x14] sm:$0xf] %vm985_vm4, %v1243_v6  ;;  %v765_v14 = vadd.f32 %v662_v10, %v264_v8  ;;  %v781_v15 = vadd.f32 %v726_v11, %v280_v9  ;;  %v664_v16 = vpop.f32.mrb[17].mxu0  ;;  %v728_v17 = vpop.f32.mrb[17].mxu1 }
 0x12c   : > { %1007 = vst.msk [vmem:[%s1715_s4 + $0x54] sm:$0xf] %vm985_vm4, %v1259_v7  ;;  %v831_v18 = vld [vmem:[#allocation2 + $0x30] sm:$0xff]  ;;  %v665_v20 = vpop.f32.mrb[18].mxu0  ;;  %v729_v21 = vpop.f32.mrb[18].mxu1 }
 0x12d   : > { %v847_v19 = vld [vmem:[#allocation2 + $0xb0] sm:$0xff]  ;;  %v1244_v22 = vpack.c.bf16 %v831_v18, %v831_v18  ;;  %798 = vst.msk [vmem:[#allocation2 + $0x40] sm:$0xff] %vm223_vm0, %v765_v14  ;;  %814 = vst.msk [vmem:[#allocation2 + $0xc0] sm:$0xff] %vm223_vm0, %v781_v15  ;;  %v766_v24 = vadd.f32 %v665_v20, %v265_v12  ;;  %v782_v25 = vadd.f32 %v729_v21, %v281_v13  ;;  %v667_v26 = vpop.f32.mrb[19].mxu0  ;;  %v731_v27 = vpop.f32.mrb[19].mxu1  ;;  %v271_v20 = vld [vmem:[#allocation2 + $0x78] sm:$0xff] }
 0x12e   : > { %v1260_v23 = vpack.c.bf16 %v847_v19, %v847_v19  ;;  %v270_v16 = vld [vmem:[#allocation2 + $0x70] sm:$0xff]  ;;  %v287_v21 = vld [vmem:[#allocation2 + $0xf8] sm:$0xff] }
 0x12f   : > { %992 = vst.msk [vmem:[%s1715_s4 + $0x18] sm:$0xf] %vm985_vm4, %v1244_v22  ;;  %v286_v17 = vld [vmem:[#allocation2 + $0xf0] sm:$0xff] }
 0x130   : > { %v832_v28 = vld [vmem:[#allocation2 + $0x38] sm:$0xff]  ;;  %1008 = vst.msk [vmem:[%s1715_s4 + $0x58] sm:$0xf] %vm985_vm4, %v1260_v23 }
 0x131   : > { %v848_v29 = vld [vmem:[#allocation2 + $0xb8] sm:$0xff]  ;;  %v1245_v30 = vpack.c.bf16 %v832_v28, %v832_v28  ;;  %799 = vst.msk [vmem:[#allocation2 + $0x48] sm:$0xff] %vm223_vm0, %v766_v24  ;;  %815 = vst.msk [vmem:[#allocation2 + $0xc8] sm:$0xff] %vm223_vm0, %v782_v25 }
 0x132   : > { %v1261_v31 = vpack.c.bf16 %v848_v29, %v848_v29  ;;  %v670_v34 = vpop.f32.mrb[20].mxu0  ;;  %v734_v35 = vpop.f32.mrb[20].mxu1 }
 0x133   : > { %993 = vst.msk [vmem:[%s1715_s4 + $0x1c] sm:$0xf] %vm985_vm4, %v1245_v30  ;;  %v767_v38 = vadd.f32 %v670_v34, %v266_v32  ;;  %v783_v39 = vadd.f32 %v734_v35, %v282_v33  ;;  %v672_v40 = vpop.f32.mrb[21].mxu0  ;;  %v736_v41 = vpop.f32.mrb[21].mxu1 }
 0x134   : > { %1009 = vst.msk [vmem:[%s1715_s4 + $0x5c] sm:$0xf] %vm985_vm4, %v1261_v31  ;;  %v833_v42 = vld [vmem:[#allocation2 + $0x40] sm:$0xff]  ;;  %v673_v44 = vpop.f32.mrb[22].mxu0  ;;  %v737_v45 = vpop.f32.mrb[22].mxu1 }
 0x135   : > { %v849_v43 = vld [vmem:[#allocation2 + $0xc0] sm:$0xff]  ;;  %v1246_v46 = vpack.c.bf16 %v833_v42, %v833_v42  ;;  %800 = vst.msk [vmem:[#allocation2 + $0x50] sm:$0xff] %vm223_vm0, %v767_v38  ;;  %816 = vst.msk [vmem:[#allocation2 + $0xd0] sm:$0xff] %vm223_vm0, %v783_v39  ;;  %v768_v48 = vadd.f32 %v673_v44, %v267_v36  ;;  %v784_v49 = vadd.f32 %v737_v45, %v283_v37  ;;  %v675_v50 = vpop.f32.mrb[23].mxu0  ;;  %v739_v51 = vpop.f32.mrb[23].mxu1 }
 0x136   : > { %v1262_v47 = vpack.c.bf16 %v849_v43, %v849_v43 }
 0x137   : > { %994 = vst.msk [vmem:[%s1715_s4 + $0x20] sm:$0xf] %vm985_vm4, %v1246_v46 }
 0x138   : > { %v834_v52 = vld [vmem:[#allocation2 + $0x48] sm:$0xff]  ;;  %1010 = vst.msk [vmem:[%s1715_s4 + $0x60] sm:$0xf] %vm985_vm4, %v1262_v47 }
 0x139   : > { %v850_v53 = vld [vmem:[#allocation2 + $0xc8] sm:$0xff]  ;;  %v1247_v54 = vpack.c.bf16 %v834_v52, %v834_v52  ;;  %801 = vst.msk [vmem:[#allocation2 + $0x58] sm:$0xff] %vm223_vm0, %v768_v48  ;;  %817 = vst.msk [vmem:[#allocation2 + $0xd8] sm:$0xff] %vm223_vm0, %v784_v49 }
 0x13a   : > { %v1263_v55 = vpack.c.bf16 %v850_v53, %v850_v53  ;;  %v678_v58 = vpop.f32.mrb[24].mxu0  ;;  %v742_v59 = vpop.f32.mrb[24].mxu1 }
 0x13b   : > { %995 = vst.msk [vmem:[%s1715_s4 + $0x24] sm:$0xf] %vm985_vm4, %v1247_v54  ;;  %v769_v62 = vadd.f32 %v678_v58, %v268_v56  ;;  %v785_v63 = vadd.f32 %v742_v59, %v284_v57  ;;  %v680_v0 = vpop.f32.mrb[25].mxu0  ;;  %v744_v1 = vpop.f32.mrb[25].mxu1 }
 0x13c   : > { %1011 = vst.msk [vmem:[%s1715_s4 + $0x64] sm:$0xf] %vm985_vm4, %v1263_v55  ;;  %v835_v2 = vld [vmem:[#allocation2 + $0x50] sm:$0xff]  ;;  %v681_v4 = vpop.f32.mrb[26].mxu0  ;;  %v745_v5 = vpop.f32.mrb[26].mxu1 }
 0x13d   : > { %v851_v3 = vld [vmem:[#allocation2 + $0xd0] sm:$0xff]  ;;  %v1248_v6 = vpack.c.bf16 %v835_v2, %v835_v2  ;;  %802 = vst.msk [vmem:[#allocation2 + $0x60] sm:$0xff] %vm223_vm0, %v769_v62  ;;  %818 = vst.msk [vmem:[#allocation2 + $0xe0] sm:$0xff] %vm223_vm0, %v785_v63  ;;  %v770_v8 = vadd.f32 %v681_v4, %v269_v60  ;;  %v786_v9 = vadd.f32 %v745_v5, %v285_v61  ;;  %v683_v10 = vpop.f32.mrb[27].mxu0  ;;  %v747_v11 = vpop.f32.mrb[27].mxu1 }
 0x13e   : > { %v1264_v7 = vpack.c.bf16 %v851_v3, %v851_v3 }
 0x13f   : > { %996 = vst.msk [vmem:[%s1715_s4 + $0x28] sm:$0xf] %vm985_vm4, %v1248_v6 }
 0x140   : > { %v836_v12 = vld [vmem:[#allocation2 + $0x58] sm:$0xff]  ;;  %1012 = vst.msk [vmem:[%s1715_s4 + $0x68] sm:$0xf] %vm985_vm4, %v1264_v7 }
 0x141   : > { %v852_v13 = vld [vmem:[#allocation2 + $0xd8] sm:$0xff]  ;;  %v1249_v14 = vpack.c.bf16 %v836_v12, %v836_v12  ;;  %803 = vst.msk [vmem:[#allocation2 + $0x68] sm:$0xff] %vm223_vm0, %v770_v8  ;;  %819 = vst.msk [vmem:[#allocation2 + $0xe8] sm:$0xff] %vm223_vm0, %v786_v9 }
 0x142   : > { %v1265_v15 = vpack.c.bf16 %v852_v13, %v852_v13  ;;  %v686_v18 = vpop.f32.mrb[28].mxu0  ;;  %v750_v19 = vpop.f32.mrb[28].mxu1 }
 0x143   : > { %997 = vst.msk [vmem:[%s1715_s4 + $0x2c] sm:$0xf] %vm985_vm4, %v1249_v14  ;;  %v771_v22 = vadd.f32 %v686_v18, %v270_v16  ;;  %v787_v23 = vadd.f32 %v750_v19, %v286_v17  ;;  %v688_v24 = vpop.f32.mrb[29].mxu0  ;;  %v752_v25 = vpop.f32.mrb[29].mxu1 }
 0x144   : > { %1013 = vst.msk [vmem:[%s1715_s4 + $0x6c] sm:$0xf] %vm985_vm4, %v1265_v15  ;;  %v837_v26 = vld [vmem:[#allocation2 + $0x60] sm:$0xff]  ;;  %v689_v28 = vpop.f32.mrb[30].mxu0  ;;  %v753_v29 = vpop.f32.mrb[30].mxu1 }
 0x145   : > { %v853_v27 = vld [vmem:[#allocation2 + $0xe0] sm:$0xff]  ;;  %v1250_v30 = vpack.c.bf16 %v837_v26, %v837_v26  ;;  %804 = vst.msk [vmem:[#allocation2 + $0x70] sm:$0xff] %vm223_vm0, %v771_v22  ;;  %820 = vst.msk [vmem:[#allocation2 + $0xf0] sm:$0xff] %vm223_vm0, %v787_v23  ;;  %v772_v32 = vadd.f32 %v689_v28, %v271_v20  ;;  %v788_v33 = vadd.f32 %v753_v29, %v287_v21  ;;  %v691_v34 = vpop.f32.mrb[31].mxu0  ;;  %v755_v35 = vpop.f32.mrb[31].mxu1 }
 0x146   : > { %v1266_v31 = vpack.c.bf16 %v853_v27, %v853_v27 }
 0x147   : > { %998 = vst.msk [vmem:[%s1715_s4 + $0x30] sm:$0xf] %vm985_vm4, %v1250_v30 }
 0x148   : > { %v838_v36 = vld [vmem:[#allocation2 + $0x68] sm:$0xff]  ;;  %1014 = vst.msk [vmem:[%s1715_s4 + $0x70] sm:$0xf] %vm985_vm4, %v1266_v31 }
 0x149   : > { %v854_v37 = vld [vmem:[#allocation2 + $0xe8] sm:$0xff]  ;;  %v1251_v38 = vpack.c.bf16 %v838_v36, %v838_v36  ;;  %805 = vst.msk [vmem:[#allocation2 + $0x78] sm:$0xff] %vm223_vm0, %v772_v32  ;;  %821 = vst.msk [vmem:[#allocation2 + $0xf8] sm:$0xff] %vm223_vm0, %v788_v33 }
 0x14a   : > { %v1267_v39 = vpack.c.bf16 %v854_v37, %v854_v37 }
 0x14b   : > { %999 = vst.msk [vmem:[%s1715_s4 + $0x34] sm:$0xf] %vm985_vm4, %v1251_v38 }
 0x14c   : > { %1015 = vst.msk [vmem:[%s1715_s4 + $0x74] sm:$0xf] %vm985_vm4, %v1267_v39  ;;  %v839_v40 = vld [vmem:[#allocation2 + $0x70] sm:$0xff] }
 0x14d   : > { %v855_v41 = vld [vmem:[#allocation2 + $0xf0] sm:$0xff]  ;;  %v1252_v42 = vpack.c.bf16 %v839_v40, %v839_v40 }
 0x14e   : > { %v1268_v43 = vpack.c.bf16 %v855_v41, %v855_v41 }
 0x14f   : > { %1000 = vst.msk [vmem:[%s1715_s4 + $0x38] sm:$0xf] %vm985_vm4, %v1252_v42 }
 0x150   : > { %v840_v44 = vld [vmem:[#allocation2 + $0x78] sm:$0xff]  ;;  %1016 = vst.msk [vmem:[%s1715_s4 + $0x78] sm:$0xf] %vm985_vm4, %v1268_v43 }
 0x151   : > { %v856_v45 = vld [vmem:[#allocation2 + $0xf8] sm:$0xff]  ;;  %v1253_v46 = vpack.c.bf16 %v840_v44, %v840_v44 }
 0x152   : > { %v1269_v47 = vpack.c.bf16 %v856_v45, %v856_v45 }
 0x153   : > { %1001 = vst.msk [vmem:[%s1715_s4 + $0x3c] sm:$0xf] %vm985_vm4, %v1253_v46 }
 0x154   : > { %1017 = vst.msk [vmem:[%s1715_s4 + $0x7c] sm:$0xf] %vm985_vm4, %v1269_v47 }
 0x155   : > { %1422 = shalt.err (!%p1419_p5)
}
 0x156   : > { %s1423_s24 = scalar_lea.hbm %s1804_s15, 2048  ;;  %s1427_s27 = scalar_lea.hbm %s1866_s2, 200704 }
 0x157   : > { %p1424_p6 = scmp.ne.s32.totalorder %s1804_s15, %s1423_s24  ;;  %p1428_p10 = scmp.lt.u32.totalorder %s1804_s15, %s1866_s2 }
 0x158   : > { %p1429_p11 = scmp.lt.u32.totalorder %s1427_s27, %s1423_s24  ;;  %p1431_p13 = scmp.lt.u32.totalorder %s1423_s24, %s1804_s15 }
 0x159   : > { %p1425_p7 = pnand %p1424_p6, %p1550_p4 }
 0x15a   : > { %p1430_p12 = por %p1429_p11, %p1428_p10 }
 0x15b   : > { %p1426_p9 = pneg %p1425_p7 }
 0x15c   : > { %p1432_p0 = por %p1431_p13, %p1430_p12 }
 0x15e   : > { %p1433_p1 = pnand %p1432_p0, %p1426_p9 }
 0x160   : > { %1436 = shalt.err (!%p1433_p1)
}
 0x161   : > { %s1493_s30 = smov 64   ;;  %s1494_s3 = smov 4  }
 0x162   : > { %1291 = dma.vmem_to_hbm [thread:$0]  (%p1550_p4), %s1806_s6, 2048, %s1804_s15, %s1818_s12, %s1493_s30, %s1493_s30, %s1494_s3  }
 0x163 PF: > { %p1297_p2 = scmp.ge.s32.totalorder %s1487_s14, 2  ;;  %s1048_s4 = sand.u32 1, %s1467_s9  }
 0x164   : > { %s1049_s5 = scalar_lea.sflag [#allocation4], %s1048_s4 }
 0x165   : > { %p1294_p3 = pnand %p1297_p2, %p1557_p8 }
 0x167   : > { %1462 = dma.done.wait (!%p1294_p3), %s1049_s5, 2048  }
 0x168   : > { %1464 = vsyncadd (!%p1294_p3), %s1049_s5, 4294965248  ;;  %s15_s14 = sadd.s32 1, %s1487_s14   ;;  %s1869_s9 = smov %s1471_s10 }
 0x169   : > { %p12_p5 = scmp.ge.s32.totalorder %s15_s14, 100   ;;  %s1870_s10 = smov %s1475_s11 }
 0x16a   : > { %s1871_s11 = smov %s1563_s22  ;;  %s1872_s12 = smov %s1483_s13 }
 0x16b   : > { %s1873_s13 = smov %s1875_s17  ;;  %14 = sbr.rel (!%p12_p5) target bundleno = 4 (0x4), region = 74 }
 0x172   :  { %1054 = vsyncpa [#allocation4], 1 }
 0x173   :  { %1056 = vsyncpa [#allocation4 + $0x1], 1 }

</bundles_post_ra>
